<compile_context>
chip_gen: v7x
topology: tpu7x:2x2x1
jax: 0.10.0
libtpu: 0.0.40
codegen_flags: <defaults>
</compile_context>

<pallas_src>
import functools

import jax
import jax.numpy as jnp
from jax.experimental import pallas as pl
from jax.experimental.pallas import tpu as pltpu

HALPE2LSP = [16, 14, 12, 11, 13, 15, 10, 8, 6, 5, 7, 9, 18, 17]
KEYP_WEIGHT = 10.0  # plain Python float (safe to close over)
_LANE = 128


def _keyp_loss_kernel_gridless(x_ref, out_ref, *, inv_n: float):
    # x_ref: [2, M, 128] in VMEM  (0: d = pred - gt, 1: weight; zero on padding)
    d = x_ref[0].astype(jnp.float32)          # [M, 128]
    w = x_ref[1].astype(jnp.float32)          # [M, 128]
    total = jnp.sum(w * d * d)                # VPU mul + XLU reduce
    mean = total * inv_n                      # mean over the B*14*2 real elems
    loss = jnp.where(mean > 300.0, 0.0, mean)  # torch `if loss > 300: loss = 0`
    out_ref[0, 0] = loss * KEYP_WEIGHT


def _keyp_loss_kernel_grid(x_ref, out_ref, acc_ref, *, inv_n: float):
    # x_ref: [2, TM, 128] block, acc_ref: (1,1) f32 SMEM scratch (persistent).
    i = pl.program_id(0)

    @pl.when(i == 0)
    def _():
        acc_ref[0, 0] = 0.0

    d = x_ref[0].astype(jnp.float32)
    w = x_ref[1].astype(jnp.float32)
    acc_ref[0, 0] += jnp.sum(w * d * d)

    @pl.when(i == pl.num_programs(0) - 1)
    def _():
        mean = acc_ref[0, 0] * inv_n
        loss = jnp.where(mean > 300.0, 0.0, mean)
        out_ref[0, 0] = loss * KEYP_WEIGHT


def keyp_loss(pred_keypoints_2d, gt_keypoints_2d, *,
              grid_block_rows: int = 512, grid_min_rows: int = 2048):
    """pred_keypoints_2d: [B, J, 2], gt_keypoints_2d: [B, J, 3] (x, y, conf)."""
    idx = jnp.asarray(HALPE2LSP, dtype=jnp.int32)

    # Keep bf16 packed if the model emits bf16; otherwise pack f32.
    compute_dtype = jnp.promote_types(pred_keypoints_2d.dtype,
                                      gt_keypoints_2d.dtype)
    pack_dtype = jnp.bfloat16 if compute_dtype == jnp.bfloat16 else jnp.float32

    # Glue in plain JAX: gathers, split, subtract, broadcast, pad, stack all
    # land in the single XLA fusion that feeds the kernel.
    pred_sel = jnp.take(pred_keypoints_2d, idx, axis=1)       # [B, 14, 2]
    gt_sel_full = jnp.take(gt_keypoints_2d, idx, axis=1)      # [B, 14, 3]
    gt_sel = gt_sel_full[..., :-1]                            # [B, 14, 2]
    conf = gt_sel_full[..., -1:]                              # [B, 14, 1]

    d = (pred_sel - gt_sel).astype(pack_dtype)                # [B, 14, 2]
    w = jnp.broadcast_to(conf, d.shape).astype(pack_dtype)    # [B, 14, 2]

    n = d.size                                                # B * 14 * 2
    if n == 0:
        # Empty batch: avoid a trace-time ZeroDivisionError.
        return {"keyp_Loss": jnp.float32(0.0)}

    m_rows = pl.cdiv(n, _LANE)
    use_grid = m_rows >= grid_min_rows
    if use_grid:
        tm = int(grid_block_rows)             # multiple of 8 (sublane constraint)
        m_rows_padded = pl.cdiv(m_rows, tm) * tm
    else:
        m_rows_padded = m_rows
    pad = m_rows_padded * _LANE - n

    def pack(a):
        flat = a.reshape(-1)
        flat = jnp.pad(flat, (0, pad))        # zero pad; w==0 there => no contribution
        return flat.reshape(m_rows_padded, _LANE)

    # Single lane-dense operand: [2, Mp, 128]  (0: diff, 1: weight)
    x = jnp.stack([pack(d), pack(w)], axis=0)

    inv_n = 1.0 / float(n)
    itemsize = jnp.dtype(pack_dtype).itemsize
    cost = pl.CostEstimate(flops=3 * n, transcendentals=0,
                           bytes_accessed=int(x.size) * int(itemsize) + 4)

    if not use_grid:
        # Fixed-overhead-bound regime: one un-pipelined DMA, whole-array VMEM.
        kernel = functools.partial(_keyp_loss_kernel_gridless, inv_n=inv_n)
        loss = pl.pallas_call(
            kernel,
            out_shape=jax.ShapeDtypeStruct((1, 1), jnp.float32),
            in_specs=[pl.BlockSpec(memory_space=pltpu.MemorySpace.VMEM)],
            out_specs=pl.BlockSpec(memory_space=pltpu.MemorySpace.SMEM),
            cost_estimate=cost,
        )(x)
    else:
        # Large-B regime: pipelined 1-D grid over M, scalar SMEM accumulator.
        kernel = functools.partial(_keyp_loss_kernel_grid, inv_n=inv_n)
        num_blocks = m_rows_padded // tm
        loss = pl.pallas_call(
            kernel,
            out_shape=jax.ShapeDtypeStruct((1, 1), jnp.float32),
            grid_spec=pltpu.PrefetchScalarGridSpec(
                num_scalar_prefetch=0,
                grid=(num_blocks,),
                in_specs=[pl.BlockSpec((2, tm, _LANE), lambda i: (0, i, 0))],
                out_specs=pl.BlockSpec((1, 1), lambda i: (0, 0),
                                       memory_space=pltpu.MemorySpace.SMEM),
                scratch_shapes=[pltpu.SMEM((1, 1), jnp.float32)],
            ),
            compiler_params=pltpu.CompilerParams(
                dimension_semantics=("arbitrary",)),
            cost_estimate=cost,
        )(x)

    return {"keyp_Loss": loss[0, 0]}


def _reference(pred_keypoints_2d, gt_keypoints_2d):
    idx = jnp.asarray(HALPE2LSP, dtype=jnp.int32)
    p = jnp.take(pred_keypoints_2d, idx, axis=1).astype(jnp.float32)
    g = jnp.take(gt_keypoints_2d, idx, axis=1).astype(jnp.float32)
    conf = g[:, :, -1:]
    loss = jnp.mean(conf * (p - g[:, :, :-1]) ** 2)
    loss = jnp.where(loss > 300.0, 0.0, loss)
    return loss * KEYP_WEIGHT


if __name__ == "__main__":
    key = jax.random.PRNGKey(0)
    k1, k2, k3 = jax.random.split(key, 3)

    # Small Halpe-style inputs (26 joints; indices up to 18 are used).
    B, J = 2, 26
    pred = jax.random.normal(k1, (B, J, 2), dtype=jnp.float32)
    gt_xy = jax.random.normal(k2, (B, J, 2), dtype=jnp.float32)
    gt_conf = jax.random.uniform(k3, (B, J, 1), dtype=jnp.float32)
    gt = jnp.concatenate([gt_xy, gt_conf], axis=-1)           # [B, J, 3]

    out = keyp_loss(pred, gt)
    loss_val = jax.block_until_ready(out["keyp_Loss"])
    ref = jax.block_until_ready(_reference(pred, gt))
    assert jnp.allclose(loss_val, ref, rtol=1e-5, atol=1e-5), (loss_val, ref)

    # Also exercise the pipelined-grid path (taken automatically at large B);
    # force it here with small thresholds so both code paths are verified.
    B2 = 64
    k4, k5, k6 = jax.random.split(jax.random.PRNGKey(1), 3)
    pred2 = jax.random.normal(k4, (B2, J, 2), dtype=jnp.float32)
    gt2 = jnp.concatenate(
        [jax.random.normal(k5, (B2, J, 2), dtype=jnp.float32),
         jax.random.uniform(k6, (B2, J, 1), dtype=jnp.float32)], axis=-1)
    out2 = keyp_loss(pred2, gt2, grid_min_rows=1, grid_block_rows=8)
    loss2 = jax.block_until_ready(out2["keyp_Loss"])
    ref2 = jax.block_until_ready(_reference(pred2, gt2))
    assert jnp.allclose(loss2, ref2, rtol=1e-5, atol=1e-5), (loss2, ref2)

    print("KERNEL_OK")
</pallas_src>

<mosaic_0001>
module attributes {stable_mosaic.version = 11 : i64} {
  func.func @_keyp_loss_kernel_gridless(%arg0: memref<2x1x128xf32, #tpu.memory_space<vmem>>, %arg1: memref<1x1xf32, #tpu.memory_space<smem>>) attributes {dimension_semantics = [], scalar_prefetch = 0 : i64, scratch_operands = 0 : i64, tpu.core_type = #tpu.core_type<tc>} {
    %c0 = arith.constant 0 : index
    %c0_0 = arith.constant 0 : index
    %c0_1 = arith.constant 0 : index
    %0 = vector.load %arg0[%c0, %c0_0, %c0_1] : memref<2x1x128xf32, #tpu.memory_space<vmem>>, vector<1x1x128xf32>
    %1 = vector.shape_cast %0 : vector<1x1x128xf32> to vector<1x128xf32>
    %c1 = arith.constant 1 : index
    %c0_2 = arith.constant 0 : index
    %c0_3 = arith.constant 0 : index
    %2 = vector.load %arg0[%c1, %c0_2, %c0_3] : memref<2x1x128xf32, #tpu.memory_space<vmem>>, vector<1x1x128xf32>
    %3 = vector.shape_cast %2 : vector<1x1x128xf32> to vector<1x128xf32>
    %4 = arith.mulf %3, %1 : vector<1x128xf32>
    %5 = arith.mulf %4, %1 : vector<1x128xf32>
    %6 = vector.shape_cast %5 : vector<1x128xf32> to vector<1x1x128xf32>
    %cst = arith.constant dense<0.000000e+00> : vector<1xf32>
    %7 = vector.multi_reduction <add>, %6, %cst [1, 2] : vector<1x1x128xf32> to vector<1xf32>
    %8 = vector.shape_cast %7 : vector<1xf32> to vector<1x1x1xf32>
    %9 = vector.extract %8[0, 0, 0] : f32 from vector<1x1x1xf32>
    %cst_4 = arith.constant 0.0178571437 : f32
    %10 = arith.mulf %9, %cst_4 : f32
    %cst_5 = arith.constant 3.000000e+02 : f32
    %11 = arith.cmpf ogt, %10, %cst_5 : f32
    %cst_6 = arith.constant 0.000000e+00 : f32
    %12 = arith.select %11, %cst_6, %10 : f32
    %cst_7 = arith.constant 1.000000e+01 : f32
    %13 = arith.mulf %12, %cst_7 : f32
    %c0_8 = arith.constant 0 : index
    %c0_9 = arith.constant 0 : index
    %14 = memref.load %arg1[%c0_8, %c0_9] : memref<1x1xf32, #tpu.memory_space<smem>>
    memref.store %13, %arg1[%c0_8, %c0_9] : memref<1x1xf32, #tpu.memory_space<smem>>
    return
  }
}

</mosaic_0001>

<bundles_post_ra>
// kernel: tpu_custom_call.1
= control target key start
LH: loop header
LB: loop body
LE: loop exit
PB: predicated region body
PF: predicated region fallthrough
CT: control target
= control target key end

     0   :  { %6 = vsyncpa [#allocation3], 0  ;;  %s139_s0 = inlined_call_operand.hbm [shape: f32[2,1,128], index: 0, kind: input, shape index: {}]   ;;  %s140_s1 = inlined_call_operand.hbm [shape: f32[1,1], index: 1, kind: output, shape index: {}]  }
   0x1   :  { %7 = vsyncpa [#allocation4], 0  ;;  %s101_s6 = smov [#allocation2]   ;;  %s65_s10 = scalar_lea.hbm %s139_s0, 32 }
   0x2   :  { %s13_s7 = sshll.u32 %s101_s6, 4  ;;  %p66_p0 = scmp.ne.s32.totalorder %s139_s0, %s65_s10  ;;  %s14_s7 = int_to_ptr.vmem [resolvable:$true] %s13_s7 }
   0x3   :  { %p69_p1 = scmp.lt.u32.totalorder %s65_s10, %s139_s0 }
   0x5   :  { %p71_p2 = pnand %p69_p1, %p66_p0 }
   0x7   :  { %74 = shalt.err (!%p71_p2)
}
   0x8   :  { %s75_s15 = scalar_lea.vmem %s14_s7, 32  ;;  %p80_p4 = scmp.lt.s32.totalorder %s14_s7, %s14_s7 }
   0x9   :  { %p76_p3 = scmp.ne.s32.totalorder %s14_s7, %s75_s15  ;;  %p81_p5 = scmp.lt.s32.totalorder %s75_s15, %s75_s15 }
   0xb   :  { %p82_p6 = por %p81_p5, %p80_p4 }
   0xd   :  { %p83_p7 = pnand %p82_p6, %p76_p3 }
   0xf   :  { %86 = shalt.err (!%p83_p7)
}
  0x10   :  { %s102_s16 = smov 16   ;;  %s103_s17 = smov 1  }
  0x11   :  { %19 = dma.hbm_to_vmem [thread:$0]  %s139_s0, 32, %s14_s7, [#allocation3], %s102_s16, %s102_s16, %s103_s17  }
  0x12   :  { %97 = dma.done.wait [#allocation3], 32  }
  0x13   :  { %98 = vsyncadd [#allocation3], 4294967264  ;;  %v23_v0 = vld [vmem:[#allocation2] sm:$0x1]  ;;  %v25_v1 = vld [vmem:[#allocation2 + $0x1] sm:$0x1] }
  0x14   :  { %v26_v2 = vmul.f32 %v25_v1, %v23_v0  ;;  %vm28_vm0 = vcmask 1040384   ;;  %s87_s24 = scalar_lea.hbm %s140_s1, 16 }
  0x15   :  { %p88_p9 = scmp.ne.s32.totalorder %s140_s1, %s87_s24  ;;  %p91_p10 = scmp.lt.u32.totalorder %s87_s24, %s140_s1 }
  0x16   :  { %v27_v3 = vmul.f32 %v26_v2, %v23_v0 }
  0x17   :  { %p93_p11 = pnand %p91_p10, %p88_p9 }
  0x18   :  { %v29_v4 = vsel %vm28_vm0, %v27_v3, 0.0 }
  0x19   :  { %30 = vadd.xlane.f32.xlu0 %v29_v4 }
  0xa6   :  { %v31_v5 = vpop.xlane.xlu0 %30 }
  0xa7   :  { %v32_v6 = vrot.slane %v31_v5, 4 }
  0xa9   :  { %v33_v7 = vadd.f32 %v32_v6, %v31_v5 }
  0xab   :  { %v34_v8 = vrot.slane %v33_v7, 2 }
  0xad   :  { %v35_v9 = vadd.f32 %v34_v8, %v33_v7 }
  0xaf   :  { %v36_v10 = vrot.slane %v35_v9, 1 }
  0xb1   :  { %v37_v11 = vadd.f32 %v36_v10, %v35_v9 }
  0xb3   :  { %59 = vpush %v37_v11 }
  0xe4   :  { %s60_s20 = spop %59 }
  0xe5   :  { %s39_s21 = smul.f32 0.017857144, %s60_s20 }
  0xe7   :  { %p40_p8 = scmp.gt.f32.partialorder %s39_s21, 300.0 }
  0xe9   :  { %s142_s21 = smov (%p40_p8, %s39_s21), 0.0 }
  0xea   :  { %s42_s0 = smul.f32 10.0, %s142_s21 }
  0xec   :  { %44 = sst [smem:[#allocation5]] %s42_s0 }
  0xed   :  { %96 = shalt.err (!%p93_p11)
}
  0xee   :  { %s104_s29 = smov [#allocation5]  }
  0xef   :  { %52 = dma.smem_to_hbm %s104_s29, 16, %s140_s1, [#allocation4]  }
  0xf0   :  { %99 = dma.done.wait [#allocation4], 16  }
  0xf1   :  { %100 = vsyncadd [#allocation4], 4294967280 }
  0xf2   :  { %56 = sfence }
  0xf3   :  { %57 = vsyncpa [#allocation3], 1 }
  0xf4   :  { %58 = vsyncpa [#allocation4], 1 }

</bundles_post_ra>
